<compile_context>
chip_gen: v6e
topology: v6e:2x2x1
jax: 0.10.0
libtpu: 0.0.40
codegen_flags: <defaults>
</compile_context>

<pallas_src>
import jax
import jax.numpy as jnp
from jax.experimental import pallas as pl
from jax.experimental.pallas import tpu as pltpu


def _round_up(v, m):
    return (v + m - 1) // m * m


def attention_pooling_kernel(batch_ref, x_ref, wt_ref, b_ref, o_ref,
                             coarse_acc, pooled_acc, cnt_acc):
    p = pl.program_id(0)          # 0: coarse-sum + counts, 1: attention + pooled
    i = pl.program_id(1)          # node-tile index
    nt = pl.num_programs(1)

    TN = x_ref.shape[0]
    Bp = coarse_acc.shape[0]

    ids = batch_ref[...]                                           # [1, TN] int32
    # One-hot membership tile built in-kernel: graphs on sublanes, nodes on lanes.
    one_hot = jax.lax.broadcasted_iota(jnp.int32, (Bp, TN), 0) == ids  # [Bp, TN] bool
    oh_f32 = one_hot.astype(jnp.float32)
    oh_bf16 = oh_f32.astype(jnp.bfloat16)

    x = x_ref[...]                                                 # [TN, Fp] bf16

    @pl.when((p == 0) & (i == 0))
    def _init():
        coarse_acc[...] = jnp.zeros_like(coarse_acc)
        pooled_acc[...] = jnp.zeros_like(pooled_acc)
        cnt_acc[...] = jnp.zeros_like(cnt_acc)

    @pl.when(p == 0)
    def _pass0():
        # Per-graph feature sums and node counts (bf16 MXU, f32 accumulate).
        coarse_acc[...] += jnp.dot(oh_bf16, x, preferred_element_type=jnp.float32)
        cnt_acc[...] += jnp.sum(oh_f32, axis=1, keepdims=True)     # [Bp, 1]

    @pl.when((p == 1) & (i == 0))
    def _finalize_coarse():
        # Turn the accumulated sums into per-graph means, once.
        inv = 1.0 / jnp.maximum(cnt_acc[...], 1.0)                 # [Bp, 1]
        coarse_acc[...] = coarse_acc[...] * inv

    @pl.when(p == 1)
    def _pass1():
        coarse_bf = coarse_acc[...].astype(jnp.bfloat16)           # [Bp, Fp]
        # scores[b, n] = <coarse[b], x[n]>   (lane-dense [Bp, TN] output)
        scores = jax.lax.dot_general(
            coarse_bf, x, (((1,), (1,)), ((), ())),
            preferred_element_type=jnp.float32)                    # [Bp, TN]
        # att[n] = scores[batch[n], n]  via masked sublane reduction
        att = jnp.sum(scores * oh_f32, axis=0, keepdims=True)      # [1, TN]
        # Fold attention weights into the membership matrix and pool in one matmul:
        # pooled[b, f] += sum_n one_hot[b, n] * att[n] * x[n, f]
        w = (oh_f32 * att).astype(jnp.bfloat16)                    # [Bp, TN]
        pooled_acc[...] += jnp.dot(w, x, preferred_element_type=jnp.float32)

    @pl.when((p == 1) & (i == nt - 1))
    def _emit():
        inv = 1.0 / jnp.maximum(cnt_acc[...], 1.0)                 # [Bp, 1]
        pooled = pooled_acc[...] * inv                             # [Bp, Fp]
        out = jnp.dot(pooled, wt_ref[...],
                      preferred_element_type=jnp.float32) + b_ref[...]
        o_ref[...] = out.astype(o_ref.dtype)


def attention_pooling(x, batch, weight, bias, num_graphs, *, tile_n=512):
    """x: [N, F], batch: [N] int32, weight: [O, F], bias: [O] -> [num_graphs, O]."""
    N, F = x.shape
    O = weight.shape[0]
    B = num_graphs

    Fp = _round_up(F, 128)                 # lane-dense features
    Op = _round_up(O, 128)                 # lane-dense output / linear head
    Bp = _round_up(B, 8)                   # sublane-aligned graph axis
    TN = min(tile_n, _round_up(N, 8))      # node tile (multiple of 8 / of 128)
    Np = _round_up(N, TN)
    nt = Np // TN

    # Glue: zero-pad and cast the big operand to bf16; batch ids as a [1, Np] row.
    # Padded nodes get id Bp (outside [0, Bp)) so they match no graph.
    x_p = jnp.zeros((Np, Fp), jnp.bfloat16).at[:N, :F].set(x.astype(jnp.bfloat16))
    batch_row = jnp.full((1, Np), Bp, jnp.int32).at[0, :N].set(batch.astype(jnp.int32))
    wt = jnp.zeros((Fp, Op), jnp.float32).at[:F, :O].set(weight.T.astype(jnp.float32))
    b = jnp.zeros((1, Op), jnp.float32).at[0, :O].set(bias.astype(jnp.float32))

    flops = 2 * Np * Bp * Fp * 3 + 2 * Bp * Fp * Op
    bytes_accessed = 2 * Np * Fp * 2 + 2 * Np * 4 + Fp * Op * 4 + (1 + Bp) * Op * 4

    out = pl.pallas_call(
        attention_pooling_kernel,
        out_shape=jax.ShapeDtypeStruct((Bp, Op), jnp.float32),
        grid_spec=pltpu.PrefetchScalarGridSpec(
            num_scalar_prefetch=0,
            grid=(2, nt),                                  # (pass, node tile)
            in_specs=[
                pl.BlockSpec((1, TN), lambda p, i: (0, i)),    # batch ids
                pl.BlockSpec((TN, Fp), lambda p, i: (i, 0)),   # x tile (bf16)
                pl.BlockSpec((Fp, Op), lambda p, i: (0, 0)),   # W^T (resident)
                pl.BlockSpec((1, Op), lambda p, i: (0, 0)),    # bias (resident)
            ],
            out_specs=pl.BlockSpec((Bp, Op), lambda p, i: (0, 0)),
            scratch_shapes=[
                pltpu.VMEM((Bp, Fp), jnp.float32),   # coarse accumulator / mean
                pltpu.VMEM((Bp, Fp), jnp.float32),   # attention-weighted pool acc
                pltpu.VMEM((Bp, 1), jnp.float32),    # per-graph node counts
            ],
        ),
        compiler_params=pltpu.CompilerParams(
            # Both axes carry sequential dependencies (pass order + accumulation).
            dimension_semantics=("arbitrary", "arbitrary"),
            vmem_limit_bytes=64 * 1024 * 1024,
        ),
        cost_estimate=pl.CostEstimate(
            flops=flops, transcendentals=0, bytes_accessed=bytes_accessed),
    )(batch_row, x_p, wt, b)

    return out[:B, :O]


def attention_pooling_ref(x, batch, weight, bias, num_graphs):
    """Pure-JAX reference mirroring the PyTorch forward."""
    B = num_graphs
    ones = jnp.ones((x.shape[0],), jnp.float32)
    cnt = jnp.maximum(jax.ops.segment_sum(ones, batch, num_segments=B), 1.0)
    coarse = jax.ops.segment_sum(x, batch, num_segments=B) / cnt[:, None]
    att = jnp.einsum("nf,nf->n", x, coarse[batch])
    xw = x * att[:, None]
    pooled = jax.ops.segment_sum(xw, batch, num_segments=B) / cnt[:, None]
    return pooled @ weight.T + bias[None, :]


if __name__ == "__main__":
    key = jax.random.PRNGKey(0)
    k_x, k_w, k_b = jax.random.split(key, 3)

    N, F, O, B = 8, 32, 16, 2            # nodes, num_in, num_out, graphs
    x = jax.random.normal(k_x, (N, F), dtype=jnp.float32)
    batch = jnp.array([0, 0, 0, 0, 1, 1, 1, 1], dtype=jnp.int32)

    # Deterministic Linear(num_in=F, num_out=O) parameters.
    bound = 1.0 / (F ** 0.5)
    weight = jax.random.uniform(k_w, (O, F), jnp.float32, -bound, bound)
    bias = jax.random.uniform(k_b, (O,), jnp.float32, -bound, bound)

    out = attention_pooling(x, batch, weight, bias, num_graphs=B)
    out = jax.block_until_ready(out)

    # Reference uses the same bf16-quantized node features the kernel ingests.
    x_bf = x.astype(jnp.bfloat16).astype(jnp.float32)
    ref = attention_pooling_ref(x_bf, batch, weight, bias, num_graphs=B)

    assert out.shape == (B, O)
    assert jnp.allclose(out, ref, atol=3e-2, rtol=3e-2), (out, ref)

    print("KERNEL_OK")
</pallas_src>

<mosaic_0001>
module attributes {stable_mosaic.version = 11 : i64} {
  func.func @attention_pooling_kernel(%arg0: i32, %arg1: i32, %arg2: memref<1x8xi32, #tpu.memory_space<vmem>>, %arg3: memref<8x128xbf16, #tpu.memory_space<vmem>>, %arg4: memref<128x128xf32, #tpu.memory_space<vmem>>, %arg5: memref<1x128xf32, #tpu.memory_space<vmem>>, %arg6: memref<8x128xf32, #tpu.memory_space<vmem>>, %arg7: memref<8x128xf32, #tpu.memory_space<vmem>>, %arg8: memref<8x128xf32, #tpu.memory_space<vmem>>, %arg9: memref<8x1xf32, #tpu.memory_space<vmem>>) attributes {dimension_semantics = [#tpu.dimension_semantics<arbitrary>, #tpu.dimension_semantics<arbitrary>], iteration_bounds = array<i64: 2, 1>, scalar_prefetch = 0 : i64, scratch_operands = 3 : i64, tpu.core_type = #tpu.core_type<tc>, window_params = [{transform_indices = @transform_0, window_bounds = array<i64: 1, 8>}, {transform_indices = @transform_1, window_bounds = array<i64: 8, 128>}, {pipeline_mode = #tpu.pipeline_mode<synchronous>, transform_indices = @transform_2, window_bounds = array<i64: 128, 128>}, {pipeline_mode = #tpu.pipeline_mode<synchronous>, transform_indices = @transform_3, window_bounds = array<i64: 1, 128>}, {pipeline_mode = #tpu.pipeline_mode<synchronous>, transform_indices = @transform_4, window_bounds = array<i64: 8, 128>}]} {
    %c0 = arith.constant 0 : index
    %c0_0 = arith.constant 0 : index
    %0 = vector.load %arg2[%c0, %c0_0] : memref<1x8xi32, #tpu.memory_space<vmem>>, vector<1x8xi32>
    %1 = tpu.iota {dimensions = array<i32: 0>} : vector<8x8xi32>
    %2 = vector.broadcast %0 : vector<1x8xi32> to vector<8x8xi32>
    %3 = arith.cmpi eq, %1, %2 : vector<8x8xi32>
    %4 = arith.extui %3 : vector<8x8xi1> to vector<8x8xi32>
    %5 = arith.sitofp %4 : vector<8x8xi32> to vector<8x8xf32>
    %6 = arith.truncf %5 : vector<8x8xf32> to vector<8x8xbf16>
    %c0_1 = arith.constant 0 : index
    %c0_2 = arith.constant 0 : index
    %7 = vector.load %arg3[%c0_1, %c0_2] : memref<8x128xbf16, #tpu.memory_space<vmem>>, vector<8x128xbf16>
    %c0_i32 = arith.constant 0 : i32
    %8 = arith.cmpi eq, %arg0, %c0_i32 : i32
    %c0_i32_3 = arith.constant 0 : i32
    %9 = arith.cmpi eq, %arg1, %c0_i32_3 : i32
    %10 = arith.andi %8, %9 : i1
    %11 = arith.extui %10 : i1 to i32
    %c0_i32_4 = arith.constant 0 : i32
    %12 = arith.cmpi ne, %11, %c0_i32_4 : i32
    scf.if %12 {
      %cst = arith.constant 0.000000e+00 : f32
      %29 = vector.broadcast %cst : f32 to vector<8x128xf32>
      %c0_14 = arith.constant 0 : index
      %c0_15 = arith.constant 0 : index
      %30 = vector.load %arg7[%c0_14, %c0_15] : memref<8x128xf32, #tpu.memory_space<vmem>>, vector<8x128xf32>
      tpu.vector_store %arg7[%c0_14, %c0_15], %29 {strides = array<i32>} : memref<8x128xf32, #tpu.memory_space<vmem>>, vector<8x128xf32>,
      %cst_16 = arith.constant 0.000000e+00 : f32
      %31 = vector.broadcast %cst_16 : f32 to vector<8x128xf32>
      %c0_17 = arith.constant 0 : index
      %c0_18 = arith.constant 0 : index
      %32 = vector.load %arg8[%c0_17, %c0_18] : memref<8x128xf32, #tpu.memory_space<vmem>>, vector<8x128xf32>
      tpu.vector_store %arg8[%c0_17, %c0_18], %31 {strides = array<i32>} : memref<8x128xf32, #tpu.memory_space<vmem>>, vector<8x128xf32>,
      %cst_19 = arith.constant 0.000000e+00 : f32
      %33 = vector.broadcast %cst_19 : f32 to vector<8x1xf32>
      %c0_20 = arith.constant 0 : index
      %c0_21 = arith.constant 0 : index
      %34 = vector.load %arg9[%c0_20, %c0_21] : memref<8x1xf32, #tpu.memory_space<vmem>>, vector<8x1xf32>
      tpu.vector_store %arg9[%c0_20, %c0_21], %33 {strides = array<i32>} : memref<8x1xf32, #tpu.memory_space<vmem>>, vector<8x1xf32>,
    } else {
    }
    %c0_i32_5 = arith.constant 0 : i32
    %13 = arith.cmpi eq, %arg0, %c0_i32_5 : i32
    %14 = arith.extui %13 : i1 to i32
    %c0_i32_6 = arith.constant 0 : i32
    %15 = arith.cmpi ne, %14, %c0_i32_6 : i32
    scf.if %15 {
      %c0_14 = arith.constant 0 : index
      %c0_15 = arith.constant 0 : index
      %29 = vector.load %arg7[%c0_14, %c0_15] : memref<8x128xf32, #tpu.memory_space<vmem>>, vector<8x128xf32>
      %cst = arith.constant dense<0.000000e+00> : vector<8x128xf32>
      %30 = tpu.matmul %6, %7, %cst {dimension_numbers = #tpu.dot_dimension_numbers<[1], [0], [0], [1], [0, 0, 1, 1], [], []>} : vector<8x8xbf16>, vector<8x128xbf16>, vector<8x128xf32> -> vector<8x128xf32>
      %31 = arith.addf %29, %30 : vector<8x128xf32>
      %c0_16 = arith.constant 0 : index
      %c0_17 = arith.constant 0 : index
      %32 = vector.load %arg7[%c0_16, %c0_17] : memref<8x128xf32, #tpu.memory_space<vmem>>, vector<8x128xf32>
      tpu.vector_store %arg7[%c0_16, %c0_17], %31 {strides = array<i32>} : memref<8x128xf32, #tpu.memory_space<vmem>>, vector<8x128xf32>,
      %c0_18 = arith.constant 0 : index
      %c0_19 = arith.constant 0 : index
      %33 = vector.load %arg9[%c0_18, %c0_19] : memref<8x1xf32, #tpu.memory_space<vmem>>, vector<8x1xf32>
      %cst_20 = arith.constant dense<0.000000e+00> : vector<8xf32>
      %34 = vector.multi_reduction <add>, %5, %cst_20 [1] : vector<8x8xf32> to vector<8xf32>
      %35 = vector.shape_cast %34 : vector<8xf32> to vector<8x1xf32>
      %36 = arith.addf %33, %35 : vector<8x1xf32>
      %c0_21 = arith.constant 0 : index
      %c0_22 = arith.constant 0 : index
      %37 = vector.load %arg9[%c0_21, %c0_22] : memref<8x1xf32, #tpu.memory_space<vmem>>, vector<8x1xf32>
      tpu.vector_store %arg9[%c0_21, %c0_22], %36 {strides = array<i32>} : memref<8x1xf32, #tpu.memory_space<vmem>>, vector<8x1xf32>,
    } else {
    }
    %c1_i32 = arith.constant 1 : i32
    %16 = arith.cmpi eq, %arg0, %c1_i32 : i32
    %c0_i32_7 = arith.constant 0 : i32
    %17 = arith.cmpi eq, %arg1, %c0_i32_7 : i32
    %18 = arith.andi %16, %17 : i1
    %19 = arith.extui %18 : i1 to i32
    %c0_i32_8 = arith.constant 0 : i32
    %20 = arith.cmpi ne, %19, %c0_i32_8 : i32
    scf.if %20 {
      %c0_14 = arith.constant 0 : index
      %c0_15 = arith.constant 0 : index
      %29 = vector.load %arg9[%c0_14, %c0_15] : memref<8x1xf32, #tpu.memory_space<vmem>>, vector<8x1xf32>
      %cst = arith.constant 1.000000e+00 : f32
      %30 = vector.broadcast %cst : f32 to vector<8x1xf32>
      %31 = arith.maximumf %29, %30 : vector<8x1xf32>
      %cst_16 = arith.constant 1.000000e+00 : f32
      %32 = vector.broadcast %cst_16 : f32 to vector<8x1xf32>
      %33 = arith.divf %32, %31 : vector<8x1xf32>
      %c0_17 = arith.constant 0 : index
      %c0_18 = arith.constant 0 : index
      %34 = vector.load %arg7[%c0_17, %c0_18] : memref<8x128xf32, #tpu.memory_space<vmem>>, vector<8x128xf32>
      %35 = vector.broadcast %33 : vector<8x1xf32> to vector<8x128xf32>
      %36 = arith.mulf %34, %35 : vector<8x128xf32>
      %c0_19 = arith.constant 0 : index
      %c0_20 = arith.constant 0 : index
      %37 = vector.load %arg7[%c0_19, %c0_20] : memref<8x128xf32, #tpu.memory_space<vmem>>, vector<8x128xf32>
      tpu.vector_store %arg7[%c0_19, %c0_20], %36 {strides = array<i32>} : memref<8x128xf32, #tpu.memory_space<vmem>>, vector<8x128xf32>,
    } else {
    }
    %c1_i32_9 = arith.constant 1 : i32
    %21 = arith.cmpi eq, %arg0, %c1_i32_9 : i32
    %22 = arith.extui %21 : i1 to i32
    %c0_i32_10 = arith.constant 0 : i32
    %23 = arith.cmpi ne, %22, %c0_i32_10 : i32
    scf.if %23 {
      %c0_14 = arith.constant 0 : index
      %c0_15 = arith.constant 0 : index
      %29 = vector.load %arg7[%c0_14, %c0_15] : memref<8x128xf32, #tpu.memory_space<vmem>>, vector<8x128xf32>
      %30 = arith.truncf %29 : vector<8x128xf32> to vector<8x128xbf16>
      %cst = arith.constant dense<0.000000e+00> : vector<8x8xf32>
      %31 = tpu.matmul %30, %7, %cst {dimension_numbers = #tpu.dot_dimension_numbers<[1], [1], [0], [0], [0, 0, 1, 0], [], []>} : vector<8x128xbf16>, vector<8x128xbf16>, vector<8x8xf32> -> vector<8x8xf32>
      %32 = arith.mulf %31, %5 : vector<8x8xf32>
      %cst_16 = arith.constant dense<0.000000e+00> : vector<8xf32>
      %33 = vector.multi_reduction <add>, %32, %cst_16 [0] : vector<8x8xf32> to vector<8xf32>
      %34 = vector.shape_cast %33 : vector<8xf32> to vector<1x8xf32>
      %35 = vector.broadcast %34 : vector<1x8xf32> to vector<8x8xf32>
      %36 = arith.mulf %5, %35 : vector<8x8xf32>
      %37 = arith.truncf %36 : vector<8x8xf32> to vector<8x8xbf16>
      %c0_17 = arith.constant 0 : index
      %c0_18 = arith.constant 0 : index
      %38 = vector.load %arg8[%c0_17, %c0_18] : memref<8x128xf32, #tpu.memory_space<vmem>>, vector<8x128xf32>
      %cst_19 = arith.constant dense<0.000000e+00> : vector<8x128xf32>
      %39 = tpu.matmul %37, %7, %cst_19 {dimension_numbers = #tpu.dot_dimension_numbers<[1], [0], [0], [1], [0, 0, 1, 1], [], []>} : vector<8x8xbf16>, vector<8x128xbf16>, vector<8x128xf32> -> vector<8x128xf32>
      %40 = arith.addf %38, %39 : vector<8x128xf32>
      %c0_20 = arith.constant 0 : index
      %c0_21 = arith.constant 0 : index
      %41 = vector.load %arg8[%c0_20, %c0_21] : memref<8x128xf32, #tpu.memory_space<vmem>>, vector<8x128xf32>
      tpu.vector_store %arg8[%c0_20, %c0_21], %40 {strides = array<i32>} : memref<8x128xf32, #tpu.memory_space<vmem>>, vector<8x128xf32>,
    } else {
    }
    %c1_i32_11 = arith.constant 1 : i32
    %24 = arith.cmpi eq, %arg0, %c1_i32_11 : i32
    %c0_i32_12 = arith.constant 0 : i32
    %25 = arith.cmpi eq, %arg1, %c0_i32_12 : i32
    %26 = arith.andi %24, %25 : i1
    %27 = arith.extui %26 : i1 to i32
    %c0_i32_13 = arith.constant 0 : i32
    %28 = arith.cmpi ne, %27, %c0_i32_13 : i32
    scf.if %28 {
      %c0_14 = arith.constant 0 : index
      %c0_15 = arith.constant 0 : index
      %29 = vector.load %arg9[%c0_14, %c0_15] : memref<8x1xf32, #tpu.memory_space<vmem>>, vector<8x1xf32>
      %cst = arith.constant 1.000000e+00 : f32
      %30 = vector.broadcast %cst : f32 to vector<8x1xf32>
      %31 = arith.maximumf %29, %30 : vector<8x1xf32>
      %cst_16 = arith.constant 1.000000e+00 : f32
      %32 = vector.broadcast %cst_16 : f32 to vector<8x1xf32>
      %33 = arith.divf %32, %31 : vector<8x1xf32>
      %c0_17 = arith.constant 0 : index
      %c0_18 = arith.constant 0 : index
      %34 = vector.load %arg8[%c0_17, %c0_18] : memref<8x128xf32, #tpu.memory_space<vmem>>, vector<8x128xf32>
      %35 = vector.broadcast %33 : vector<8x1xf32> to vector<8x128xf32>
      %36 = arith.mulf %34, %35 : vector<8x128xf32>
      %c0_19 = arith.constant 0 : index
      %c0_20 = arith.constant 0 : index
      %37 = vector.load %arg4[%c0_19, %c0_20] : memref<128x128xf32, #tpu.memory_space<vmem>>, vector<128x128xf32>
      %cst_21 = arith.constant dense<0.000000e+00> : vector<8x128xf32>
      %38 = tpu.matmul %36, %37, %cst_21 {dimension_numbers = #tpu.dot_dimension_numbers<[1], [0], [0], [1], [0, 0, 1, 1], [], []>} : vector<8x128xf32>, vector<128x128xf32>, vector<8x128xf32> -> vector<8x128xf32>
      %c0_22 = arith.constant 0 : index
      %c0_23 = arith.constant 0 : index
      %39 = vector.load %arg5[%c0_22, %c0_23] : memref<1x128xf32, #tpu.memory_space<vmem>>, vector<1x128xf32>
      %40 = vector.broadcast %39 : vector<1x128xf32> to vector<8x128xf32>
      %41 = arith.addf %38, %40 : vector<8x128xf32>
      %c0_24 = arith.constant 0 : index
      %c0_25 = arith.constant 0 : index
      %42 = vector.load %arg6[%c0_24, %c0_25] : memref<8x128xf32, #tpu.memory_space<vmem>>, vector<8x128xf32>
      tpu.vector_store %arg6[%c0_24, %c0_25], %41 {strides = array<i32>} : memref<8x128xf32, #tpu.memory_space<vmem>>, vector<8x128xf32>,
    } else {
    }
    return
  }
  func.func @transform_0(%arg0: i32, %arg1: i32) -> (i32, i32) {
    %c0_i32 = arith.constant 0 : i32
    %c0_i32_0 = arith.constant 0 : i32
    return %c0_i32, %arg1 : i32, i32
  }
  func.func @transform_1(%arg0: i32, %arg1: i32) -> (i32, i32) {
    %c0_i32 = arith.constant 0 : i32
    %c0_i32_0 = arith.constant 0 : i32
    return %arg1, %c0_i32 : i32, i32
  }
  func.func @transform_2(%arg0: i32, %arg1: i32) -> (i32, i32) {
    %c0_i32 = arith.constant 0 : i32
    %c0_i32_0 = arith.constant 0 : i32
    %c0_i32_1 = arith.constant 0 : i32
    return %c0_i32, %c0_i32_0 : i32, i32
  }
  func.func @transform_3(%arg0: i32, %arg1: i32) -> (i32, i32) {
    %c0_i32 = arith.constant 0 : i32
    %c0_i32_0 = arith.constant 0 : i32
    %c0_i32_1 = arith.constant 0 : i32
    return %c0_i32, %c0_i32_0 : i32, i32
  }
  func.func @transform_4(%arg0: i32, %arg1: i32) -> (i32, i32) {
    %c0_i32 = arith.constant 0 : i32
    %c0_i32_0 = arith.constant 0 : i32
    %c0_i32_1 = arith.constant 0 : i32
    return %c0_i32, %c0_i32_0 : i32, i32
  }
}

</mosaic_0001>

<bundles_post_ra>
// kernel: tpu_custom_call.1
= control target key start
LH: loop header
LB: loop body
LE: loop exit
PB: predicated region body
PF: predicated region fallthrough
CT: control target
= control target key end

     0   :  { %9 = vsyncpa [#allocation6], 0  ;;  %s1111_s0 = inlined_call_operand.hbm [shape: s32[1,8], index: 0, kind: input, shape index: {}]   ;;  %s1112_s1 = inlined_call_operand.hbm [shape: bf16[8,128], index: 1, kind: input, shape index: {}]   ;;  %s1113_s2 = inlined_call_operand.hbm [shape: f32[128,128], index: 2, kind: input, shape index: {}]   ;;  %s1114_s3 = inlined_call_operand.vmem [shape: f32[1,128], index: 3, kind: input, shape index: {}]   ;;  %s1115_s4 = inlined_call_operand.hbm [shape: f32[8,128], index: 4, kind: output, shape index: {}]  }
   0x1   :  { %10 = vsyncpa [#allocation9], 0 }
   0x2   :  { %11 = vsyncpa [#allocation7], 0  ;;  %s981_s15 = smov 0   ;;  %s983_s16 = smov 0  }
   0x3   :  { %s985_s17 = smov 0  }
   0x4 LB: > { %s940_s18 = smov [#allocation8]   ;;  %s622_s20 = sadd.s32 4294967295, %s938_s17   ;;  %s938_s17 = sphi %s985_s17, %s17_s17   ;;  %s934_s16 = sphi %s983_s16, %s1122_s16   ;;  %s930_s15 = sphi %s981_s15, %s1121_s15  }
   0x5   : > { %s177_s19 = sshll.u32 %s940_s18, 4  ;;  %p623_p0 = scmp.ge.s32.totalorder %s938_s17, 1  ;;  %s178_s19 = int_to_ptr.vmem [resolvable:$true] %s177_s19 }
   0x6   : > { %p149_p1 = scmp.lt.s32.totalorder %s938_s17, 3  ;;  %p1001_p2 = scmp.eq.s32.totalorder %s622_s20, 0 }
   0x7   : > { %s29_s23 = sadd.s32 1, %s934_s16  ;;  %s941_s26 = smov [#allocation5]  }
   0x8   : > { %p1005_p3 = pnand %p623_p0, %p149_p1  ;;  %p1018_p6 = scmp.ge.s32.totalorder %s29_s23, 2 }
   0x9   : > { %s164_s27 = sshll.u32 %s941_s26, 4  ;;  %s813_s28 = scalar_lea.vmem %s178_s19, 64  ;;  %s165_s27 = int_to_ptr.vmem [resolvable:$true] %s164_s27 }
   0xa   : > { %p738_p4 = pneg %p1005_p3  ;;  %p814_p8 = scmp.ne.s32.totalorder %s178_s19, %s813_s28 }
   0xb   : > { %p821_p11 = scmp.lt.s32.totalorder %s178_s19, %s178_s19  ;;  %p822_p12 = scmp.lt.s32.totalorder %s813_s28, %s813_s28 }
   0xc   : > { %p1014_p5 = pnand %p1001_p2, %p738_p4 }
   0xd   : > { %p823_p13 = por %p822_p12, %p821_p11 }
   0xe   : > { %p804_p7 = pneg %p1014_p5 }
  0x10   : > { %p816_p9 = pnand %p814_p8, %p804_p7 }
  0x12   : > { %p817_p10 = pneg %p816_p9 }
  0x14   : > { %p824_p0 = pnand %p823_p13, %p817_p10 }
  0x16   : > { %827 = shalt.err (!%p824_p0)
}
  0x17   : > { %744 = dma.hbm_to_vmem [thread:$0]  (!%p1014_p5), %s1112_s1, 64, %s178_s19, [#allocation9]  }
  0x18   : > { %s1124_s23 = smov (%p1018_p6, %s29_s23), 0  ;;  %s839_s5 = scalar_lea.vmem %s165_s27, 16 }
  0x19   : > { %p840_p1 = scmp.ne.s32.totalorder %s165_s27, %s839_s5  ;;  %s846_s6 = scalar_lea.vmem %s165_s27, 32 }
  0x1a   : > { %p847_p9 = scmp.lt.s32.totalorder %s165_s27, %s165_s27  ;;  %p848_p10 = scmp.lt.s32.totalorder %s846_s6, %s839_s5 }
  0x1b   : > { %p842_p4 = pnand %p840_p1, %p804_p7 }
  0x1c   : > { %p849_p11 = por %p848_p10, %p847_p9 }
  0x1d   : > { %p843_p8 = pneg %p842_p4 }
  0x1f   : > { %p850_p12 = pnand %p849_p11, %p843_p8 }
  0x21   : > { %853 = shalt.err (!%p850_p12)
}
  0x22   : > { %741 = dma.hbm_to_vmem [thread:$0]  (!%p1014_p5), %s1111_s0, 16, %s165_s27, [#allocation6]  }
  0x23   : > { %s942_s9 = smov [#allocation10]  }
  0x24   : > { %s187_s10 = sshll.u32 %s942_s9, 4  ;;  %s188_s10 = int_to_ptr.vmem [resolvable:$true] %s187_s10 }
  0x25   : > { %s865_s11 = scalar_lea.vmem %s188_s10, 2048  ;;  %p873_p1 = scmp.lt.s32.totalorder %s188_s10, %s188_s10 }
  0x26   : > { %p866_p6 = scmp.ne.s32.totalorder %s188_s10, %s865_s11  ;;  %p874_p4 = scmp.lt.s32.totalorder %s865_s11, %s865_s11 }
  0x28   : > { %p868_p13 = pnand %p866_p6, %p804_p7  ;;  %p875_p8 = por %p874_p4, %p873_p1 }
  0x2a   : > { %p869_p0 = pneg %p868_p13 }
  0x2c   : > { %p876_p9 = pnand %p875_p8, %p869_p0 }
  0x2e   : > { %879 = shalt.err (!%p876_p9)
}
  0x2f   : > { %s943_s12 = smov 128   ;;  %s944_s13 = smov 8  }
  0x30   : > { %747 = dma.hbm_to_vmem [thread:$0]  (!%p1014_p5), %s1113_s2, 2048, %s188_s10, [#allocation9], %s943_s12, %s943_s12, %s944_s13  }
  0x31   : > { %206 = sbr.rel (%p1005_p3) target bundleno = 1201 (0x4b1), region = 36 }
  0x36   : > { %917 = dma.done.wait (%p1001_p2), [#allocation6], 16  }
  0x37   : > { %919 = vsyncadd (%p1001_p2), [#allocation6], 4294967280 }
  0x38   : > { %921 = dma.done.wait (%p1001_p2), [#allocation9], 2112  }
  0x39   : > { %923 = vsyncadd (%p1001_p2), [#allocation9], 4294965184  ;;  %v232_v0 = vlaneseq  ;;  %p243_p7 = scmp.eq.s32.totalorder %s930_s15, 0  ;;  %v631_v2 = vld [vmem:[#allocation5] ss:$0 sm:$0xff]  ;;  %v945_v4 = vmov 0.0  }
  0x3a   : > { %v1063_v3 = vld [vmem:[#allocation8] sm:$0xf]  ;;  %vm251_vm1 = vcmask (%p243_p7), 7168   ;;  %v946_v7 = vmov (%p243_p7), 0.0  }
  0x3b   : > { %v233_v1 = vshrl.u32 %v232_v0, 7  ;;  %248 = sbr.rel (!%p243_p7) target bundleno = 64 (0x40), region = 52  ;;  %249 = vst [vmem:[#allocation2] sm:$0xff] (%p243_p7), %v946_v7  ;;  %250 = vst [vmem:[#allocation3] sm:$0xff] (%p243_p7), %v946_v7 }
  0x3c   : > { %252 = vst.msk [vmem:[#allocation4] sm:$0xff] (%p243_p7), %vm251_vm1, %v946_v7 }
  0x3d   : > { %vm238_vm0 = vcmp.eq.s32.totalorder %v233_v1, %v631_v2 }
  0x3e   : > { %v1065_v5 = vsel %vm238_vm0, 1.0, %v945_v4 }
  0x3f   : > { %v241_v6 = vpack.c.bf16 %v1065_v5, %v1065_v5 }
  0x40 PF: > { %p634_p2 = scmp.ne.s32.totalorder %s930_s15, 0 }
  0x42   : > { %255 = sbr.rel (%p634_p2) target bundleno = 275 (0x113), region = 56 }
  0x47   : > { %vm261_vm2 = vcmask 1043456   ;;  %vm257_vm3 = vcmask 64512   ;;  %v947_v8 = vmov 0.0   ;;  %vm948_vm4 = vmmov 0   ;;  %v307_v11 = vld [vmem:[#allocation4] sm:$0xff]  ;;  %v256_v14 = vld [vmem:[#allocation2] sm:$0xff] }
  0x48   : > { %669 = vmatprep.subr.bf16.mxu0 %v947_v8  ;;  %v263_v9 = vsel %vm261_vm2, %v1063_v3, 0  ;;  %671 = vmatprep.mubr.msk.bf16.mxu0 %vm948_vm4, %v947_v8  ;;  %v308_v10 = vsel %vm257_vm3, %v1065_v5, 0.0  ;;  %vm312_vm5 = vcmask 7168  }
  0x49   : > { %670 = vmatpush3.bf16.msra.mxu0 %v263_v9  ;;  %309 = vadd.xlane.f32.xlu0 %v308_v10 }
  0x4c   : > { %672 = vmatmul.mubr.msk.bf16.vlgmr.msra.gmra.mxu0 %vm257_vm3, %v241_v6 }
  0xd2   : > { %v310_v12 = vpop.xlane.xlu0 %309 }
  0xd3   : > { %v311_v13 = vadd.f32 %v310_v12, %v307_v11 }
  0xd5   : > { %313 = vst.msk [vmem:[#allocation4] sm:$0xff] %vm312_vm5, %v311_v13 }
 0x10c   : > { %v299_v15 = vpop.f32.mrf.mxu0 }
 0x10d   : > { %v305_v16 = vadd.f32 %v299_v15, %v256_v14 }
 0x10e   : > { %v673_v17 = vpop.f32.mrf.mxu0 }
 0x10f   : > { %306 = vst [vmem:[#allocation2] sm:$0xff] %v305_v16 }
 0x110   : > { %v302_v18 = vpop.f32.mrf.mxu0 }
 0x112   : > { %v674_v19 = vpop.f32.mrf.mxu0 }
 0x113 PF: > { %p314_p3 = scmp.eq.s32.totalorder %s930_s15, 1 }
 0x114   : > { %v319_v20 = vld [vmem:[#allocation4] sm:$0xff] (%p314_p3)  ;;  %v949_v21 = vmov (%p314_p3), 0  }
 0x115   : > { %318 = sbr.rel (!%p314_p3) target bundleno = 420 (0x1a4), region = 60  ;;  %796 = vset.pattern.permute.xlu0 (%p314_p3), %v949_v21  ;;  %v320_v22 = vmax.f32 (%p314_p3), %v319_v20, 1.0 }
 0x116   : > { %v323_v24 = vld [vmem:[#allocation2] sm:$0xff] (%p314_p3) }
 0x117   : > { %797 = vrcp.f32 (%p314_p3), %v320_v22 }
 0x124   : > { %v798_v23 = vpop.eup %797 }
 0x125   : > { %326 = vperm.xlu0 %796, %v798_v23  }
 0x1a0   : > { %v327_v25 = vpop.permute.xlu0 %326 }
 0x1a1   : > { %v329_v26 = vmul.f32 %v327_v25, %v323_v24 }
 0x1a3   : > { %330 = vst [vmem:[#allocation2] sm:$0xff] %v329_v26 }
 0x1a4 PF: > { %p637_p5 = scmp.ne.s32.totalorder %s930_s15, 1 }
 0x1a6   : > { %333 = sbr.rel (%p637_p5) target bundleno = 847 (0x34f), region = 64 }
 0x1ab   : > { %v950_v27 = vmov 0.0   ;;  %vm951_vm6 = vmmov 0   ;;  %v334_v28 = vld [vmem:[#allocation2] sm:$0xff]  ;;  %vm391_vm7 = vcmask 1043456   ;;  %vm377_vm8 = vcmask 64512   ;;  %v387_v45 = vld [vmem:[#allocation3] sm:$0xff] }
 0x1ac   : > { %675 = vmatprep.subr.bf16.mxu0 %v950_v27  ;;  %677 = vmatprep.mubr.msk.bf16.mxu0 %vm951_vm6, %v950_v27  ;;  %v335_v29 = vpack.c.bf16 %v334_v28, %v334_v28  ;;  %v393_v30 = vsel %vm391_vm7, %v1063_v3, 0 }
 0x1ad   : > { %676 = vmatpush3.bf16.xpose.msra.mxu0 %v1063_v3  ;;  %681 = vmatprep.subr.bf16.mxu1 %v950_v27 }
 0x1ae   : > { %683 = vmatprep.mubr.msk.bf16.mxu1 %vm951_vm6, %v950_v27  ;;  %682 = vmatpush3.bf16.msra.mxu1 %v393_v30 }
 0x1b4   : > { %678 = vmatmul.mubr.bf16.vlgmr.msra.gmra.mxu0 %v335_v29 }
 0x274   : > { %v370_v31 = vpop.f32.mrf.mxu0 }
 0x275   : > { %v376_v32 = vmul.f32 %v1065_v5, %v370_v31 }
 0x276   : > { %v679_v33 = vpop.f32.mrf.mxu0 }
 0x277   : > { %v378_v34 = vsel %vm377_vm8, %v376_v32, 0.0 }
 0x278   : > { %v379_v35 = vrot.slane %v378_v34, 4  ;;  %v373_v36 = vpop.f32.mrf.mxu0 }
 0x27a   : > { %v380_v37 = vadd.f32 %v379_v35, %v378_v34  ;;  %v680_v38 = vpop.f32.mrf.mxu0 }
 0x27c   : > { %v381_v39 = vrot.slane %v380_v37, 2 }
 0x27e   : > { %v382_v40 = vadd.f32 %v381_v39, %v380_v37 }
 0x280   : > { %v383_v41 = vrot.slane %v382_v40, 1 }
 0x282   : > { %v384_v42 = vadd.f32 %v383_v41, %v382_v40 }
 0x284   : > { %v385_v43 = vmul.f32 %v1065_v5, %v384_v42 }
 0x286   : > { %v386_v44 = vpack.c.bf16 %v385_v43, %v385_v43 }
 0x288   : > { %684 = vmatmul.mubr.msk.bf16.vlgmr.msra.gmra.mxu1 %vm377_vm8, %v386_v44 }
 0x348   : > { %v429_v46 = vpop.f32.mrf.mxu1 }
 0x349   : > { %v435_v47 = vadd.f32 %v429_v46, %v387_v45 }
 0x34a   : > { %v685_v48 = vpop.f32.mrf.mxu1 }
 0x34b   : > { %436 = vst [vmem:[#allocation3] sm:$0xff] %v435_v47 }
 0x34c   : > { %v432_v49 = vpop.f32.mrf.mxu1 }
 0x34e   : > { %v686_v50 = vpop.f32.mrf.mxu1 }
 0x34f PF: > { %438 = sbr.rel (!%p314_p3) target bundleno = 1186 (0x4a2), region = 68  ;;  %v439_v51 = vld [vmem:[#allocation4] sm:$0xff] (%p314_p3)  ;;  %v952_v53 = vmov (%p314_p3), 0   ;;  %v953_v55 = vmov (%p314_p3), 0.0   ;;  %v463_v57 = vld [vmem:[#allocation10 + $0x68] sm:$0xff] (%p314_p3)  ;;  %v462_v58 = vld [vmem:[#allocation10 + $0x60] sm:$0xff] (%p314_p3) }
 0x350   : > { %v465_v52 = vld [vmem:[#allocation10 + $0x78] sm:$0xff] (%p314_p3)  ;;  %799 = vset.pattern.permute.xlu0 (%p314_p3), %v952_v53  ;;  %v440_v54 = vmax.f32 (%p314_p3), %v439_v51, 1.0  ;;  %687 = vmatprep.subr.mxu0 (%p314_p3), %v953_v55  ;;  %v464_v56 = vld [vmem:[#allocation10 + $0x70] sm:$0xff] (%p314_p3)  ;;  %v459_v61 = vld [vmem:[#allocation10 + $0x48] sm:$0xff] (%p314_p3)  ;;  %vm954_vm9 = vmmov (%p314_p3), 0  }
 0x351   : > { %688 = vmatpush3.msra.mxu0 (%p314_p3), %v465_v52  ;;  %v461_v59 = vld [vmem:[#allocation10 + $0x58] sm:$0xff] (%p314_p3)  ;;  %v460_v60 = vld [vmem:[#allocation10 + $0x50] sm:$0xff] (%p314_p3)  ;;  %v458_v62 = vld [vmem:[#allocation10 + $0x40] sm:$0xff] (%p314_p3)  ;;  %719 = vmatprep.mubr.msk.f32.mxu0 (%p314_p3), %vm954_vm9, %v953_v55 }
 0x352   : > { %800 = vrcp.f32 (%p314_p3), %v440_v54  ;;  %689 = vmatprep.subr.mxu0 (%p314_p3), %v953_v55  ;;  %v457_v63 = vld [vmem:[#allocation10 + $0x38] sm:$0xff] (%p314_p3)  ;;  %v456_v1 = vld [vmem:[#allocation10 + $0x30] sm:$0xff] (%p314_p3)  ;;  %v455_v2 = vld [vmem:[#allocation10 + $0x28] sm:$0xff] (%p314_p3) }
 0x353   : > { %690 = vmatpush3.msra.mxu0 (%p314_p3), %v464_v56  ;;  %v454_v3 = vld [vmem:[#allocation10 + $0x20] sm:$0xff] (%p314_p3)  ;;  %v453_v4 = vld [vmem:[#allocation10 + $0x18] sm:$0xff] (%p314_p3)  ;;  %v452_v5 = vld [vmem:[#allocation10 + $0x10] sm:$0xff] (%p314_p3) }
 0x354   : > { %691 = vmatprep.subr.mxu0 %v953_v55  ;;  %v451_v6 = vld [vmem:[#allocation10 + $0x8] sm:$0xff]  ;;  %v450_v7 = vld [vmem:[#allocation10] sm:$0xff] }
 0x355   : > { %692 = vmatpush3.msra.mxu0 %v463_v57  ;;  %v443_v8 = vld [vmem:[#allocation3] sm:$0xff]  ;;  %v639_v11 = vld [vmem:[%s1114_s3] ss:$0 sm:$0xff] }
 0x356   : > { %693 = vmatprep.subr.mxu0 %v953_v55 }
 0x357   : > { %694 = vmatpush3.msra.mxu0 %v462_v58 }
 0x358   : > { %695 = vmatprep.subr.mxu0 %v953_v55 }
 0x359   : > { %696 = vmatpush3.msra.mxu0 %v461_v59 }
 0x35a   : > { %697 = vmatprep.subr.mxu0 %v953_v55 }
 0x35b   : > { %698 = vmatpush3.msra.mxu0 %v460_v60 }
 0x35c   : > { %699 = vmatprep.subr.mxu0 %v953_v55 }
 0x35d   : > { %700 = vmatpush3.msra.mxu0 %v459_v61 }
 0x35e   : > { %701 = vmatprep.subr.mxu0 %v953_v55 }
 0x35f   : > { %v801_v0 = vpop.eup %800  ;;  %702 = vmatpush3.msra.mxu0 %v458_v62 }
 0x360   : > { %446 = vperm.xlu0 %799, %v801_v0   ;;  %703 = vmatprep.subr.mxu0 %v953_v55 }
 0x361   : > { %704 = vmatpush3.msra.mxu0 %v457_v63 }
 0x362   : > { %705 = vmatprep.subr.mxu0 %v953_v55 }
 0x363   : > { %706 = vmatpush3.msra.mxu0 %v456_v1 }
 0x364   : > { %707 = vmatprep.subr.mxu0 %v953_v55 }
 0x365   : > { %708 = vmatpush3.msra.mxu0 %v455_v2 }
 0x366   : > { %709 = vmatprep.subr.mxu0 %v953_v55 }
 0x367   : > { %710 = vmatpush3.msra.mxu0 %v454_v3 }
 0x368   : > { %711 = vmatprep.subr.mxu0 %v953_v55 }
 0x369   : > { %712 = vmatpush3.msra.mxu0 %v453_v4 }
 0x36a   : > { %713 = vmatprep.subr.mxu0 %v953_v55 }
 0x36b   : > { %714 = vmatpush3.msra.mxu0 %v452_v5 }
 0x36c   : > { %715 = vmatprep.subr.mxu0 %v953_v55 }
 0x36d   : > { %716 = vmatpush3.msra.mxu0 %v451_v6 }
 0x36e   : > { %717 = vmatprep.subr.mxu0 %v953_v55 }
 0x36f   : > { %718 = vmatpush3.msra.mxu0 %v450_v7 }
 0x3db   : > { %v447_v9 = vpop.permute.xlu0 %446 }
 0x3dc   : > { %v449_v10 = vmul.f32 %v447_v9, %v443_v8 }
 0x3de   : > { %720 = vmatmul.mubr.f32.vlgmr.msra.gmra.mxu0 %v449_v10 }
 0x49e   : > { %v539_v12 = vpop.f32.mrf.mxu0 }
 0x49f   : > { %v540_v13 = vadd.f32 %v639_v11, %v539_v12 }
 0x4a0   : > { %v721_v14 = vpop.f32.mrf.mxu0 }
 0x4a1   : > { %543 = vst [vmem:[#allocation11] sm:$0xff] %v540_v13 }
 0x4a2 PF: > { %p1087_p10 = scmp.eq.s32.totalorder %s622_s20, 1  ;;  %s955_s22 = smov [#allocation11]  }
 0x4a3   : > { %s551_s24 = sshll.u32 %s955_s22, 4  ;;  %s552_s24 = int_to_ptr.vmem [resolvable:$true] %s551_s24 }
 0x4a4   : > { %s880_s25 = scalar_lea.vmem %s552_s24, 128  ;;  %p887_p13 = scmp.lt.s32.totalorder %s552_s24, %s552_s24 }
 0x4a5   : > { %p881_p11 = scmp.ne.s32.totalorder %s552_s24, %s880_s25  ;;  %p888_p0 = scmp.lt.s32.totalorder %s880_s25, %s880_s25 }
 0x4a7   : > { %p882_p12 = pnand %p881_p11, %p1087_p10  ;;  %p889_p1 = por %p888_p0, %p887_p13 }
 0x4a9   : > { %p883_p6 = pneg %p882_p12 }
 0x4ab   : > { %p890_p4 = pnand %p889_p1, %p883_p6 }
 0x4ad   : > { %893 = shalt.err (!%p890_p4)
}
 0x4ae   : > { %735 = dma.vmem_to_hbm [thread:$0]  (%p1087_p10), %s552_s24, 128, %s1115_s4, [#allocation7]  }
 0x4af   : > { %925 = dma.done.wait (%p1087_p10), [#allocation7], 128  }
 0x4b0   : > { %927 = vsyncadd (%p1087_p10), [#allocation7], 4294967168 }
 0x4b1 PF: > { %s17_s17 = sadd.s32 1, %s938_s17   ;;  %s1121_s15 = smov %s934_s16 }
 0x4b2   : > { %p14_p8 = scmp.ge.s32.totalorder %s17_s17, 4   ;;  %s1122_s16 = smov %s1124_s23 }
 0x4b4   :  { %16 = sbr.rel (!%p14_p8) target bundleno = 4 (0x4), region = 95 }
 0x4b9   :  { %564 = vsyncpa [#allocation6], 1 }
 0x4ba   :  { %566 = vsyncpa [#allocation6 + $0x1], 1 }
 0x4bb   :  { %567 = vsyncpa [#allocation9], 1 }
 0x4bc   :  { %568 = vsyncpa [#allocation7], 1 }
 0x4bd   :  { %570 = vsyncpa [#allocation7 + $0x1], 1 }

</bundles_post_ra>
